<compile_context>
chip_gen: v6e
topology: v6e:2x2x1
jax: 0.10.0
libtpu: 0.0.40
codegen_flags: <defaults>
</compile_context>

<pallas_src>
import jax
import jax.numpy as jnp
from jax.experimental import pallas as pl
from jax.experimental.pallas import tpu as pltpu


def _round_up(x, m):
    return ((x + m - 1) // m) * m


def _linear_kernel(x_ref, wt_ref, b_ref, o_ref):
    # x_ref : [tm, F]  streamed input-row tile
    # wt_ref: [F, E]   pre-transposed weight, resident (constant block)
    # b_ref : [1, E]   bias, resident (constant block)
    # o_ref : [tm, E]  output tile
    acc = jnp.dot(x_ref[...], wt_ref[...], preferred_element_type=jnp.float32)
    o_ref[...] = (acc + b_ref[...].astype(jnp.float32)).astype(o_ref.dtype)


def graph_embedding(x, weight, bias, *, tm_max=2048,
                    vmem_budget_bytes=20 * 1024 * 1024,
                    vmem_limit_bytes=32 * 1024 * 1024,
                    compute_dtype=None):
    """Equivalent of nn.Linear(input_size, embedding_size)(x).

    x:      [B, S, F]
    weight: [E, F]   (PyTorch layout: out_features x in_features)
    bias:   [E]
    returns [B, S, E] in x.dtype
    """
    B, S, F = x.shape
    E = weight.shape[0]
    M = B * S
    out_dtype = x.dtype

    x2d = x.reshape(M, F)            # free reshape (contiguous)
    wt = weight.T                    # one-time tiny [F, E] relayout (host/XLA)
    b2d = bias.reshape(1, E)
    if compute_dtype is not None:
        x2d = x2d.astype(compute_dtype)
        wt = wt.astype(compute_dtype)

    in_item = jnp.dtype(x2d.dtype).itemsize
    w_item = jnp.dtype(wt.dtype).itemsize
    b_item = jnp.dtype(b2d.dtype).itemsize
    out_item = jnp.dtype(out_dtype).itemsize

    # --- tile sizing: double-buffered x + out blocks, resident weight/bias ---
    fixed_bytes = 2 * F * E * w_item + 2 * E * b_item
    per_row_bytes = 2 * F * in_item + 2 * E * out_item
    tm = (vmem_budget_bytes - fixed_bytes) // max(per_row_bytes, 1)
    tm = max(8, min(tm, tm_max, _round_up(M, 8)))
    tm = max(8, (tm // 8) * 8)
    # Keep >= 2 M-blocks when possible so v7x megacore shards across both TCs
    # (harmless on single-TC v5e/v6e).
    if M >= 16:
        tm = min(tm, _round_up(-(-M // 2), 8))
    if tm > M:          # only possible when M < 8: use the full (ragged) dim
        tm = M
    grid_m = -(-M // tm)   # ceil; Pallas masks the ragged last block on store

    cost = pl.CostEstimate(
        flops=2 * M * E * F,
        transcendentals=0,
        bytes_accessed=(M * F * in_item + F * E * w_item
                        + E * b_item + M * E * out_item),
    )

    out = pl.pallas_call(
        _linear_kernel,
        out_shape=jax.ShapeDtypeStruct((M, E), out_dtype),
        grid_spec=pltpu.PrefetchScalarGridSpec(
            num_scalar_prefetch=0,
            grid=(grid_m,),
            in_specs=[
                pl.BlockSpec((tm, F), lambda i: (i, 0)),   # x tile (streamed)
                pl.BlockSpec((F, E), lambda i: (0, 0)),    # weight (DMA'd once)
                pl.BlockSpec((1, E), lambda i: (0, 0)),    # bias   (DMA'd once)
            ],
            out_specs=pl.BlockSpec((tm, E), lambda i: (i, 0)),
        ),
        compiler_params=pltpu.CompilerParams(
            dimension_semantics=("parallel",),
            vmem_limit_bytes=vmem_limit_bytes,
        ),
        cost_estimate=cost,
    )(x2d, wt, b2d)

    return out.reshape(B, S, E)


if __name__ == "__main__":
    # Shapes consistent with the module: batch=2, seq=8, input_size=4,
    # embedding_size=32.
    B, S, F, E = 2, 8, 4, 32

    key = jax.random.PRNGKey(0)
    kx, kw, kb = jax.random.split(key, 3)

    x = jax.random.normal(kx, (B, S, F), dtype=jnp.float32)
    # Deterministic init mimicking nn.Linear default (uniform in +/- 1/sqrt(F)).
    bound = 1.0 / float(F) ** 0.5
    weight = jax.random.uniform(kw, (E, F), dtype=jnp.float32,
                                minval=-bound, maxval=bound)
    bias = jax.random.uniform(kb, (E,), dtype=jnp.float32,
                              minval=-bound, maxval=bound)

    y = jax.block_until_ready(graph_embedding(x, weight, bias))
    ref = x @ weight.T + bias
    assert y.shape == (B, S, E)
    assert jnp.allclose(y, ref, atol=1e-5, rtol=1e-5)

    # Second check: multi-block ragged M (1200 rows, tm=512 -> 3 blocks, last
    # one partial) and non-128-multiple E exercise the boundary-masking path
    # with no host pad/slice.  Small-integer data keeps every precision path
    # exact so the comparison is tight.
    B2, S2, F2, E2 = 3, 400, 64, 160
    k2 = jax.random.PRNGKey(1)
    k2x, k2w, k2b = jax.random.split(k2, 3)
    x2 = jax.random.randint(k2x, (B2, S2, F2), -2, 3).astype(jnp.float32)
    w2 = jax.random.randint(k2w, (E2, F2), -1, 2).astype(jnp.float32)
    b2 = jax.random.randint(k2b, (E2,), -3, 4).astype(jnp.float32)
    y2 = jax.block_until_ready(graph_embedding(x2, w2, b2, tm_max=512))
    ref2 = x2 @ w2.T + b2
    assert y2.shape == (B2, S2, E2)
    assert jnp.allclose(y2, ref2, atol=1e-5, rtol=1e-5)

    print("KERNEL_OK")
</pallas_src>

<mosaic_0001>
module attributes {stable_mosaic.version = 11 : i64} {
  func.func @_linear_kernel(%arg0: i32, %arg1: memref<8x4xf32, #tpu.memory_space<vmem>>, %arg2: memref<4x32xf32, #tpu.memory_space<vmem>>, %arg3: memref<1x32xf32, #tpu.memory_space<vmem>>, %arg4: memref<8x32xf32, #tpu.memory_space<vmem>>) attributes {dimension_semantics = [#tpu.dimension_semantics<parallel>], iteration_bounds = array<i64: 2>, scalar_prefetch = 0 : i64, scratch_operands = 0 : i64, tpu.core_type = #tpu.core_type<tc>, window_params = [{transform_indices = @transform_0, window_bounds = array<i64: 8, 4>}, {pipeline_mode = #tpu.pipeline_mode<synchronous>, transform_indices = @transform_1, window_bounds = array<i64: 4, 32>}, {pipeline_mode = #tpu.pipeline_mode<synchronous>, transform_indices = @transform_2, window_bounds = array<i64: 1, 32>}, {transform_indices = @transform_3, window_bounds = array<i64: 8, 32>}]} {
    %c0 = arith.constant 0 : index
    %c0_0 = arith.constant 0 : index
    %0 = vector.load %arg1[%c0, %c0_0] : memref<8x4xf32, #tpu.memory_space<vmem>>, vector<8x4xf32>
    %c0_1 = arith.constant 0 : index
    %c0_2 = arith.constant 0 : index
    %1 = vector.load %arg2[%c0_1, %c0_2] : memref<4x32xf32, #tpu.memory_space<vmem>>, vector<4x32xf32>
    %cst = arith.constant dense<0.000000e+00> : vector<8x32xf32>
    %2 = tpu.matmul %0, %1, %cst {dimension_numbers = #tpu.dot_dimension_numbers<[1], [0], [0], [1], [0, 0, 1, 1], [], []>} : vector<8x4xf32>, vector<4x32xf32>, vector<8x32xf32> -> vector<8x32xf32>
    %c0_3 = arith.constant 0 : index
    %c0_4 = arith.constant 0 : index
    %3 = vector.load %arg3[%c0_3, %c0_4] : memref<1x32xf32, #tpu.memory_space<vmem>>, vector<1x32xf32>
    %4 = vector.broadcast %3 : vector<1x32xf32> to vector<8x32xf32>
    %5 = arith.addf %2, %4 : vector<8x32xf32>
    %c0_5 = arith.constant 0 : index
    %c0_6 = arith.constant 0 : index
    %6 = vector.load %arg4[%c0_5, %c0_6] : memref<8x32xf32, #tpu.memory_space<vmem>>, vector<8x32xf32>
    tpu.vector_store %arg4[%c0_5, %c0_6], %5 {strides = array<i32>} : memref<8x32xf32, #tpu.memory_space<vmem>>, vector<8x32xf32>,
    return
  }
  func.func @transform_0(%arg0: i32) -> (i32, i32) {
    %c0_i32 = arith.constant 0 : i32
    %c0_i32_0 = arith.constant 0 : i32
    return %arg0, %c0_i32 : i32, i32
  }
  func.func @transform_1(%arg0: i32) -> (i32, i32) {
    %c0_i32 = arith.constant 0 : i32
    %c0_i32_0 = arith.constant 0 : i32
    %c0_i32_1 = arith.constant 0 : i32
    return %c0_i32, %c0_i32_0 : i32, i32
  }
  func.func @transform_2(%arg0: i32) -> (i32, i32) {
    %c0_i32 = arith.constant 0 : i32
    %c0_i32_0 = arith.constant 0 : i32
    %c0_i32_1 = arith.constant 0 : i32
    return %c0_i32, %c0_i32_0 : i32, i32
  }
  func.func @transform_3(%arg0: i32) -> (i32, i32) {
    %c0_i32 = arith.constant 0 : i32
    %c0_i32_0 = arith.constant 0 : i32
    return %arg0, %c0_i32 : i32, i32
  }
}

</mosaic_0001>

<bundles_post_ra>
// kernel: tpu_custom_call.1
= control target key start
LH: loop header
LB: loop body
LE: loop exit
PB: predicated region body
PF: predicated region fallthrough
CT: control target
= control target key end

     0   :  { %8 = vsyncpa [#allocation3], 0  ;;  %s573_s0 = inlined_call_operand.vmem [shape: f32[16,4], index: 0, kind: input, shape index: {}]   ;;  %s574_s1 = inlined_call_operand.vmem [shape: f32[4,32], index: 1, kind: input, shape index: {}]   ;;  %s575_s2 = inlined_call_operand.vmem [shape: f32[1,32], index: 2, kind: input, shape index: {}]   ;;  %s576_s3 = inlined_call_operand.hbm [shape: f32[16,32], index: 3, kind: output, shape index: {}]  }
   0x1   :  { %10 = vsyncpa [#allocation3 + $0x1], 0  ;;  %s474_s12 = smov 0   ;;  %s476_s13 = smov 0  }
   0x2   :  { %s478_s14 = smov 0   ;;  %s480_s15 = smov 0  }
   0x3 LB: > { %s495_s16 = sadd.s32 4294967295, %s449_s15   ;;  %s328_s17 = sadd.s32 4294967294, %s449_s15   ;;  %s449_s15 = sphi %s480_s15, %s582_s15   ;;  %s445_s14 = sphi %s478_s14, %s581_s14   ;;  %s441_s13 = sphi %s476_s13, %s580_s13   ;;  %s437_s12 = sphi %s474_s12, %s579_s12  }
   0x4   : > { %s499_s18 = sadd.s32 1, %s449_s15   ;;  %s91_s19 = sadd.s32 1, %s445_s14 }
   0x5   : > { %s88_s20 = ssub.s32 %s449_s15, %s499_s18  ;;  %p101_p0 = scmp.ne.s32.totalorder %s445_s14, %s441_s13 }
   0x6   : > { %p89_p1 = scmp.eq.s32.totalorder %s88_s20, 0  ;;  %p102_p2 = scmp.eq.s32.totalorder %s495_s16, 1 }
   0x7   : > { %p107_p3 = scmp.ne.s32.totalorder %s441_s13, %s437_s12  ;;  %p108_p4 = scmp.eq.s32.totalorder %s328_s17, 1 }
   0x8   : > { %s510_s21 = scalar_select %p89_p1, %s445_s14, %s91_s19  }
   0x9   : > { %p512_p5 = por %p102_p2, %p101_p0  ;;  %p516_p6 = por %p108_p4, %p107_p3 }
   0xa   : > { %p331_p7 = scmp.ge.s32.totalorder %s449_s15, 1  ;;  %p139_p8 = scmp.lt.s32.totalorder %s449_s15, 3 }
   0xc   : > { %p140_p9 = pnand %p331_p7, %p139_p8 }
   0xd   : > { %p162_p10 = scmp.lt.s32.totalorder (!%p140_p9), %s495_s16, 1  ;;  %s159_s4 = sand.u32 (!%p140_p9), 1, %s441_s13  }
   0xe   : > { %143 = sbr.rel (%p140_p9) target bundleno = 232 (0xe8), region = 32  ;;  %s332_s5 = sshll.u32 (!%p140_p9), %s159_s4, 3 }
   0xf   : > { %s338_s8 = sshll.u32 (!%p140_p9), %s495_s16, 7  ;;  %s161_s9 = scalar_lea.vmem (!%p140_p9), [#allocation2], %s332_s5 }
  0x10   : > { %s269_s10 = sshll.u32 (!%p140_p9), %s161_s9, 4  ;;  %s538_s19 = scalar_lea.hbm (!%p140_p9), %s576_s3, %s338_s8  ;;  %s270_s10 = int_to_ptr.vmem [resolvable:$true] %s269_s10 }
  0x11   : > { %s256_s20 = scalar_lea.sflag (!%p140_p9), [#allocation3], %s159_s4  ;;  %s389_s24 = scalar_lea.vmem (!%p140_p9), %s270_s10, 128 }
  0x12   : > { %p390_p11 = scmp.ne.s32.totalorder (!%p140_p9), %s270_s10, %s389_s24 }
  0x13   : > { %v167_v0 = vld [vmem:[%s574_s1] sm:$0xf]  ;;  %vm179_vm0 = vcmask 1043456   ;;  %v451_v1 = vmov 0.0   ;;  %vm452_vm1 = vmmov 0   ;;  %s163_s26 = scalar_select %p162_p10, %s495_s16, 1 }
  0x14   : > { %343 = vmatprep.subr.mxu0 %v451_v1  ;;  %345 = vmatprep.mubr.msk.f32.mxu0 %vm452_vm1, %v451_v1  ;;  %vm175_vm2 = vcmask 31744   ;;  %v334_v3 = vld [vmem:[%s575_s2] ss:$0 sm:$0xff]  ;;  %vm253_vm3 = vcmask 261120   ;;  %p391_p12 = pnand %p390_p11, %p512_p5  ;;  %s453_s16 = smov [#allocation2]  }
  0x15   : > { %344 = vmatpush3.msk.msra.mxu0 %vm179_vm0, %v167_v0  ;;  %s333_s27 = sshll.u32 %s163_s26, 3  ;;  %s393_s25 = sshll.u32 %s453_s16, 4  ;;  %s394_s25 = int_to_ptr.vmem [resolvable:$false] %s393_s25 }
  0x16   : > { %s165_s30 = scalar_lea.vmem %s573_s0, %s333_s27  ;;  %p392_p13 = pneg %p391_p12 }
  0x17   : > { %v166_v2 = vld [vmem:[%s165_s30] sm:$0xff]  ;;  %s395_s26 = scalar_lea.vmem %s394_s25, 256  ;;  %p396_p0 = scmp.lt.s32.totalorder %s270_s10, %s394_s25 }
  0x18   : > { %346 = vmatmul.mubr.msk.f32.vlgmr.msra.gmra.mxu0 %vm175_vm2, %v166_v2  ;;  %p397_p1 = scmp.lt.s32.totalorder %s395_s26, %s389_s24 }
  0x1a   : > { %p398_p2 = por %p397_p1, %p396_p0 }
  0x1c   : > { %p399_p3 = pnand %p398_p2, %p392_p13 }
  0xd8   : > { %v249_v4 = vpop.f32.mrf.mxu0 }
  0xd9   : > { %v250_v5 = vadd.f32 %v334_v3, %v249_v4 }
  0xda   : > { %v347_v6 = vpop.f32.mrf.mxu0 }
  0xdb   : > { %254 = vst.msk [vmem:[%s161_s9] sm:$0xff] %vm253_vm3, %v250_v5 }
  0xdc   : > { %402 = shalt.err (!%p399_p3)
}
  0xdd   : > { %s403_s27 = scalar_lea.hbm %s538_s19, 128  ;;  %s407_s30 = scalar_lea.hbm %s576_s3, 256 }
  0xde   : > { %p404_p4 = scmp.ne.s32.totalorder %s538_s19, %s403_s27  ;;  %p408_p9 = scmp.lt.s32.totalorder %s538_s19, %s576_s3 }
  0xdf   : > { %p409_p10 = scmp.lt.s32.totalorder %s407_s30, %s403_s27 }
  0xe0   : > { %p405_p7 = pnand %p404_p4, %p512_p5 }
  0xe1   : > { %p410_p11 = por %p409_p10, %p408_p9 }
  0xe2   : > { %p406_p8 = pneg %p405_p7 }
  0xe4   : > { %p411_p12 = pnand %p410_p11, %p406_p8 }
  0xe6   : > { %414 = shalt.err (!%p411_p12)
}
  0xe7   : > { %348 = dma.vmem_to_hbm [thread:$0]  (%p512_p5), %s270_s10, 128, %s538_s19, %s256_s20  }
  0xe8 PF: > { %p354_p13 = scmp.ge.s32.totalorder %s449_s15, 2  ;;  %s281_s6 = sand.u32 1, %s437_s12  }
  0xe9   : > { %s282_s7 = scalar_lea.sflag [#allocation3], %s281_s6 }
  0xea   : > { %p351_p0 = pnand %p354_p13, %p516_p6 }
  0xec   : > { %p352_p1 = pneg %p351_p0 }
  0xee   : > { %432 = dma.done.wait (%p352_p1), %s282_s7, 128  }
  0xef   : > { %434 = vsyncadd (%p352_p1), %s282_s7, 4294967168  ;;  %p13_p2 = scmp.ge.s32.totalorder %s499_s18, 4   ;;  %s579_s12 = smov %s441_s13 }
  0xf0   : > { %s580_s13 = smov %s445_s14  ;;  %s581_s14 = smov %s510_s21 }
  0xf1   : > { %s582_s15 = smov %s499_s18  ;;  %15 = sbr.rel (!%p13_p2) target bundleno = 3 (0x3), region = 67 }
  0xf6   :  { %287 = vsyncpa [#allocation3], 1 }
  0xf7   :  { %289 = vsyncpa [#allocation3 + $0x1], 1 }

</bundles_post_ra>
